<compile_context>
chip_gen: v7x
topology: tpu7x:2x2x1
jax: 0.10.0
libtpu: 0.0.40
codegen_flags: <defaults>
</compile_context>

<pallas_src>
import functools

import jax
import jax.numpy as jnp
from jax.experimental import pallas as pl
from jax.experimental.pallas import tpu as pltpu


def _gather_scale_shift_kernel(types_ref, x_ref, scales_ref, shifts_ref, o_ref, *,
                               num_types: int,
                               has_scales: bool, has_shifts: bool,
                               scales_shortcut: bool, shifts_shortcut: bool):
    """Per-type gather + addcmul over one lane-dense (TM_ROWS, 128) tile.

    The per-type gather (torch embedding over a tiny table) is a statically
    unrolled VPU compare/select chain against SMEM-resident tables; the addcmul
    is plain VPU elementwise.  HBM-bandwidth bound at small type counts.
    """
    x = x_ref[...].astype(jnp.float32)        # (TM_ROWS, 128)
    t = types_ref[...]                        # (TM_ROWS, 128) int32

    sc = None
    sh = None
    if has_scales:
        if scales_shortcut:
            sc = scales_ref[0]                # scalar
        else:
            sc = jnp.full_like(x, scales_ref[0])
    if has_shifts:
        if shifts_shortcut:
            sh = shifts_ref[0]
        else:
            sh = jnp.full_like(x, shifts_ref[0])

    # Statically unrolled over the (small) number of atom types.
    for k in range(1, num_types):
        is_k = t == k
        if has_scales and not scales_shortcut:
            sc = jnp.where(is_k, scales_ref[k], sc)
        if has_shifts and not shifts_shortcut:
            sh = jnp.where(is_k, shifts_ref[k], sh)

    out = x
    if has_scales:
        out = sc * out
    if has_shifts:
        out = out + sh
    o_ref[...] = out.astype(o_ref.dtype)


def _scalar_scale_shift_kernel(x_ref, scales_ref, shifts_ref, o_ref, *,
                               has_scales: bool, has_shifts: bool):
    """Scalar-shortcut path: no atom-types stream is DMA'd at all."""
    out = x_ref[...].astype(jnp.float32)
    if has_scales:
        out = scales_ref[0] * out
    if has_shifts:
        out = out + shifts_ref[0]
    o_ref[...] = out.astype(o_ref.dtype)


class PerTypeScaleShiftPallas:
    """JAX/Pallas equivalent of nequip's PerTypeScaleShift forward pass."""

    def __init__(self, type_names, scales=None, shifts=None,
                 scales_trainable=False, shifts_trainable=False):
        self.type_names = list(type_names)
        self.num_types = len(type_names)
        out_dtype = jnp.float32  # TODO(synk): float64 in the original module

        def _canon(v, trainable):
            if v is None:
                return None, True
            if isinstance(v, (float, int)):
                v = [float(v)]
            if isinstance(v, dict):
                assert set(self.type_names) == set(v.keys())
                v = [float(v[name]) for name in self.type_names]
            arr = jnp.asarray(v, dtype=out_dtype)
            if trainable and arr.size == 1:
                arr = jnp.ones((self.num_types,), dtype=out_dtype) * arr
            assert arr.shape == (self.num_types,) or arr.size == 1
            arr = arr.reshape(-1, 1)
            shortcut = arr.size == 1
            return arr, shortcut

        self.scales, self.scales_shortcut = _canon(scales, scales_trainable)
        self.shifts, self.shifts_shortcut = _canon(shifts, shifts_trainable)
        self.has_scales = self.scales is not None
        self.has_shifts = self.shifts is not None

    def __call__(self, field, atom_types, *, lane_dense_output: bool = False):
        """field: (N, 1) float32; atom_types: (N,) or (N, 1) int32.

        Returns (N, 1) float32, or the padded lane-dense (rows, 128) view if
        ``lane_dense_output`` (only the first N flat elements are valid).
        """
        out_dtype = jnp.float32
        if not (self.has_scales or self.has_shifts):
            return field.reshape(-1, 1).astype(out_dtype)

        n = field.shape[0]
        LANES = 128

        need_gather = ((self.has_scales and not self.scales_shortcut)
                       or (self.has_shifts and not self.shifts_shortcut))

        # ---- lane-dense layout (minimal pad only) ---------------------------
        rows = pl.cdiv(n, LANES)
        n_pad = rows * LANES          # pad <= 127 elements, just for the reshape
        x_flat = field.reshape(-1).astype(out_dtype)
        t_flat = None
        if need_gather:
            t_flat = atom_types.reshape(-1)
            if t_flat.dtype != jnp.int32:
                t_flat = t_flat.astype(jnp.int32)
        if n_pad != n:
            x_flat = jnp.pad(x_flat, (0, n_pad - n))
            if need_gather:
                t_flat = jnp.pad(t_flat, (0, n_pad - n))
        x2d = x_flat.reshape(rows, LANES)
        t2d = t_flat.reshape(rows, LANES) if need_gather else None

        # ---- tile selection --------------------------------------------------
        # 1 MiB f32 per stream cap (safe on v5e's 16 MiB scoped VMEM with double
        # buffering); aim for >= ~4 grid steps so both v7x TCs get work.  Pallas
        # handles the ragged last block; no round-up of rows to tile multiples.
        if rows <= 8:
            tm_rows = rows            # single block == full array (legal shape)
        else:
            ROW_CAP = 2048
            target = ((pl.cdiv(rows, 4) + 7) // 8) * 8
            tm_rows = max(8, min(ROW_CAP, target))
        grid = (pl.cdiv(rows, tm_rows),)

        block = pl.BlockSpec((tm_rows, LANES), lambda i: (i, 0))
        smem = pl.BlockSpec(memory_space=pltpu.MemorySpace.SMEM)

        # Tiny per-type tables, flattened to 1-D and kept in SMEM.
        scales_tbl = (self.scales.reshape(-1) if self.has_scales
                      else jnp.zeros((1,), out_dtype))
        shifts_tbl = (self.shifts.reshape(-1) if self.has_shifts
                      else jnp.zeros((1,), out_dtype))
        num_types = max(int(scales_tbl.shape[0]), int(shifts_tbl.shape[0]))

        if need_gather:
            kernel = functools.partial(
                _gather_scale_shift_kernel,
                num_types=num_types,
                has_scales=self.has_scales, has_shifts=self.has_shifts,
                scales_shortcut=self.scales_shortcut if self.has_scales else True,
                shifts_shortcut=self.shifts_shortcut if self.has_shifts else True,
            )
            in_specs = [block, block, smem, smem]
            args = (t2d, x2d, scales_tbl, shifts_tbl)
        else:
            kernel = functools.partial(
                _scalar_scale_shift_kernel,
                has_scales=self.has_scales, has_shifts=self.has_shifts,
            )
            in_specs = [block, smem, smem]
            args = (x2d, scales_tbl, shifts_tbl)

        out2d = pl.pallas_call(
            kernel,
            out_shape=jax.ShapeDtypeStruct((rows, LANES), out_dtype),
            grid_spec=pltpu.PrefetchScalarGridSpec(
                num_scalar_prefetch=0,
                grid=grid,
                in_specs=in_specs,
                out_specs=block,
            ),
            compiler_params=pltpu.CompilerParams(
                dimension_semantics=("parallel",)),
        )(*args)

        if lane_dense_output:
            # Padded lane-dense view; only the first n flat elements are valid.
            return out2d
        return out2d.reshape(-1)[:n].reshape(n, 1)


def _reference_gather(field, atom_types, scales, shifts):
    """Pure-JAX reference mirroring the torch forward (gather path)."""
    x = field.astype(jnp.float32)
    t = atom_types.reshape(-1)
    return shifts[t] + scales[t] * x          # (N, 1)


if __name__ == "__main__":
    key = jax.random.PRNGKey(0)
    type_names = ["C", "H", "O", "N"]

    scales_dict = {"C": 1.5, "H": 0.5, "O": 2.0, "N": 0.25}
    shifts_dict = {"C": -1.0, "H": 0.1, "O": 3.0, "N": -0.5}

    # --- test 1: per-type gather path, small N (not a multiple of 128) -------
    n1 = 200
    k1, k2, k3, k4 = jax.random.split(key, 4)
    field1 = jax.random.normal(k1, (n1, 1), dtype=jnp.float32)
    types1 = jax.random.randint(k2, (n1,), 0, len(type_names), dtype=jnp.int32)

    module = PerTypeScaleShiftPallas(type_names, scales=scales_dict,
                                     shifts=shifts_dict)
    out1 = jax.block_until_ready(module(field1, types1))
    ref1 = _reference_gather(field1, types1, module.scales, module.shifts)
    assert out1.shape == (n1, 1), out1.shape
    assert jnp.allclose(out1, ref1, atol=1e-6, rtol=1e-6), "gather path mismatch"

    # --- test 2: scalar-shortcut path (types stream not DMA'd at all) --------
    module_sc = PerTypeScaleShiftPallas(type_names, scales=2.0, shifts=-0.5)
    out2 = jax.block_until_ready(module_sc(field1, types1))
    ref2 = field1.astype(jnp.float32) * 2.0 - 0.5
    assert out2.shape == (n1, 1), out2.shape
    assert jnp.allclose(out2, ref2, atol=1e-6, rtol=1e-6), "shortcut path mismatch"

    # --- test 3: multi-block grid with a ragged last block --------------------
    n3 = 4993  # rows = 40, tm_rows = 16, grid = 3 (last block ragged)
    field3 = jax.random.normal(k3, (n3, 1), dtype=jnp.float32)
    types3 = jax.random.randint(k4, (n3,), 0, len(type_names), dtype=jnp.int32)
    out3 = jax.block_until_ready(module(field3, types3))
    ref3 = _reference_gather(field3, types3, module.scales, module.shifts)
    assert out3.shape == (n3, 1), out3.shape
    assert jnp.allclose(out3, ref3, atol=1e-6, rtol=1e-6), "ragged grid mismatch"

    print("KERNEL_OK")
</pallas_src>

<mosaic_0001>
module attributes {stable_mosaic.version = 11 : i64} {
  func.func @_gather_scale_shift_kernel(%arg0: i32, %arg1: memref<2x128xi32, #tpu.memory_space<vmem>>, %arg2: memref<2x128xf32, #tpu.memory_space<vmem>>, %arg3: memref<4xf32, #tpu.memory_space<smem>>, %arg4: memref<4xf32, #tpu.memory_space<smem>>, %arg5: memref<2x128xf32, #tpu.memory_space<vmem>>) attributes {dimension_semantics = [#tpu.dimension_semantics<parallel>], iteration_bounds = array<i64: 1>, scalar_prefetch = 0 : i64, scratch_operands = 0 : i64, tpu.core_type = #tpu.core_type<tc>, window_params = [{transform_indices = @transform_0, window_bounds = array<i64: 2, 128>}, {transform_indices = @transform_1, window_bounds = array<i64: 2, 128>}, {transform_indices = @transform_2, window_bounds = array<i64: 4>}, {transform_indices = @transform_3, window_bounds = array<i64: 4>}, {transform_indices = @transform_4, window_bounds = array<i64: 2, 128>}]} {
    %c0 = arith.constant 0 : index
    %c0_0 = arith.constant 0 : index
    %0 = vector.load %arg2[%c0, %c0_0] : memref<2x128xf32, #tpu.memory_space<vmem>>, vector<2x128xf32>
    %c0_1 = arith.constant 0 : index
    %c0_2 = arith.constant 0 : index
    %1 = vector.load %arg1[%c0_1, %c0_2] : memref<2x128xi32, #tpu.memory_space<vmem>>, vector<2x128xi32>
    %c0_3 = arith.constant 0 : index
    %2 = memref.load %arg3[%c0_3] : memref<4xf32, #tpu.memory_space<smem>>
    %3 = vector.broadcast %2 : f32 to vector<2x128xf32>
    %c0_4 = arith.constant 0 : index
    %4 = memref.load %arg4[%c0_4] : memref<4xf32, #tpu.memory_space<smem>>
    %5 = vector.broadcast %4 : f32 to vector<2x128xf32>
    %c1_i32 = arith.constant 1 : i32
    %6 = vector.broadcast %c1_i32 : i32 to vector<2x128xi32>
    %7 = arith.cmpi eq, %1, %6 : vector<2x128xi32>
    %c1 = arith.constant 1 : index
    %8 = memref.load %arg3[%c1] : memref<4xf32, #tpu.memory_space<smem>>
    %9 = vector.broadcast %8 : f32 to vector<2x128xf32>
    %10 = arith.select %7, %9, %3 : vector<2x128xi1>, vector<2x128xf32>
    %c1_5 = arith.constant 1 : index
    %11 = memref.load %arg4[%c1_5] : memref<4xf32, #tpu.memory_space<smem>>
    %12 = vector.broadcast %11 : f32 to vector<2x128xf32>
    %13 = arith.select %7, %12, %5 : vector<2x128xi1>, vector<2x128xf32>
    %c2_i32 = arith.constant 2 : i32
    %14 = vector.broadcast %c2_i32 : i32 to vector<2x128xi32>
    %15 = arith.cmpi eq, %1, %14 : vector<2x128xi32>
    %c2 = arith.constant 2 : index
    %16 = memref.load %arg3[%c2] : memref<4xf32, #tpu.memory_space<smem>>
    %17 = vector.broadcast %16 : f32 to vector<2x128xf32>
    %18 = arith.select %15, %17, %10 : vector<2x128xi1>, vector<2x128xf32>
    %c2_6 = arith.constant 2 : index
    %19 = memref.load %arg4[%c2_6] : memref<4xf32, #tpu.memory_space<smem>>
    %20 = vector.broadcast %19 : f32 to vector<2x128xf32>
    %21 = arith.select %15, %20, %13 : vector<2x128xi1>, vector<2x128xf32>
    %c3_i32 = arith.constant 3 : i32
    %22 = vector.broadcast %c3_i32 : i32 to vector<2x128xi32>
    %23 = arith.cmpi eq, %1, %22 : vector<2x128xi32>
    %c3 = arith.constant 3 : index
    %24 = memref.load %arg3[%c3] : memref<4xf32, #tpu.memory_space<smem>>
    %25 = vector.broadcast %24 : f32 to vector<2x128xf32>
    %26 = arith.select %23, %25, %18 : vector<2x128xi1>, vector<2x128xf32>
    %c3_7 = arith.constant 3 : index
    %27 = memref.load %arg4[%c3_7] : memref<4xf32, #tpu.memory_space<smem>>
    %28 = vector.broadcast %27 : f32 to vector<2x128xf32>
    %29 = arith.select %23, %28, %21 : vector<2x128xi1>, vector<2x128xf32>
    %30 = arith.mulf %26, %0 : vector<2x128xf32>
    %31 = arith.addf %30, %29 : vector<2x128xf32>
    %c0_8 = arith.constant 0 : index
    %c0_9 = arith.constant 0 : index
    %32 = vector.load %arg5[%c0_8, %c0_9] : memref<2x128xf32, #tpu.memory_space<vmem>>, vector<2x128xf32>
    tpu.vector_store %arg5[%c0_8, %c0_9], %31 {strides = array<i32>} : memref<2x128xf32, #tpu.memory_space<vmem>>, vector<2x128xf32>,
    return
  }
  func.func @transform_0(%arg0: i32) -> (i32, i32) {
    %c0_i32 = arith.constant 0 : i32
    %c0_i32_0 = arith.constant 0 : i32
    return %arg0, %c0_i32 : i32, i32
  }
  func.func @transform_1(%arg0: i32) -> (i32, i32) {
    %c0_i32 = arith.constant 0 : i32
    %c0_i32_0 = arith.constant 0 : i32
    return %arg0, %c0_i32 : i32, i32
  }
  func.func @transform_2(%arg0: i32) -> i32 {
    %c0_i32 = arith.constant 0 : i32
    %c0_i32_0 = arith.constant 0 : i32
    return %c0_i32 : i32
  }
  func.func @transform_3(%arg0: i32) -> i32 {
    %c0_i32 = arith.constant 0 : i32
    %c0_i32_0 = arith.constant 0 : i32
    return %c0_i32 : i32
  }
  func.func @transform_4(%arg0: i32) -> (i32, i32) {
    %c0_i32 = arith.constant 0 : i32
    %c0_i32_0 = arith.constant 0 : i32
    return %arg0, %c0_i32 : i32, i32
  }
}

</mosaic_0001>

<bundles_post_ra>
// kernel: tpu_custom_call.1
= control target key start
LH: loop header
LB: loop body
LE: loop exit
PB: predicated region body
PF: predicated region fallthrough
CT: control target
= control target key end

     0   :  { %9 = vsyncpa [#allocation3], 0  ;;  %s250_s0 = inlined_call_operand.hbm [shape: s32[2,128], index: 0, kind: input, shape index: {}]   ;;  %s251_s1 = inlined_call_operand.vmem [shape: f32[2,128], index: 1, kind: input, shape index: {}]   ;;  %s252_s2 = inlined_call_operand.vmem [shape: f32[4], index: 2, kind: input, shape index: {}]   ;;  %s253_s3 = inlined_call_operand.vmem [shape: f32[4], index: 3, kind: input, shape index: {}]   ;;  %s254_s4 = inlined_call_operand.hbm [shape: f32[2,128], index: 4, kind: output, shape index: {}]  }
   0x1   :  { %10 = vsyncpa [#allocation5], 0 }
   0x2   :  { %11 = vsyncpa [#allocation8], 0 }
   0x3   :  { %12 = vsyncpa [#allocation4], 0  ;;  %s31_s17 = sshll.u32 %s252_s2, 4  ;;  %s188_s18 = smov [#allocation2]   ;;  %s32_s17 = int_to_ptr.vmem [resolvable:$true] %s31_s17 }
   0x4   :  { %s19_s19 = sshll.u32 %s188_s18, 4  ;;  %s112_s22 = scalar_lea.hbm %s250_s0, 32  ;;  %s20_s19 = int_to_ptr.vmem [resolvable:$true] %s19_s19 }
   0x5   :  { %p113_p0 = scmp.ne.s32.totalorder %s250_s0, %s112_s22  ;;  %p116_p1 = scmp.lt.u32.totalorder %s112_s22, %s250_s0 }
   0x7   :  { %p118_p2 = pnand %p116_p1, %p113_p0 }
   0x9   :  { %121 = shalt.err (!%p118_p2)
}
   0xa   :  { %s122_s27 = scalar_lea.vmem %s20_s19, 32  ;;  %p127_p4 = scmp.lt.s32.totalorder %s20_s19, %s20_s19 }
   0xb   :  { %p123_p3 = scmp.ne.s32.totalorder %s20_s19, %s122_s27  ;;  %p128_p5 = scmp.lt.s32.totalorder %s122_s27, %s122_s27 }
   0xd   :  { %p129_p6 = por %p128_p5, %p127_p4 }
   0xf   :  { %p130_p7 = pnand %p129_p6, %p123_p3 }
  0x11   :  { %133 = shalt.err (!%p130_p7)
}
  0x12   :  { %22 = dma.hbm_to_vmem [thread:$0]  %s250_s0, 32, %s20_s19, [#allocation3]  }
  0x13   :  { %s134_s29 = scalar_lea.vmem %s32_s17, 16  ;;  %p139_p9 = scmp.lt.s32.totalorder %s32_s17, %s32_s17 }
  0x14   :  { %p135_p8 = scmp.ne.s32.totalorder %s32_s17, %s134_s29  ;;  %p140_p10 = scmp.lt.s32.totalorder %s134_s29, %s134_s29 }
  0x16   :  { %p141_p11 = por %p140_p10, %p139_p9 }
  0x18   :  { %p142_p12 = pnand %p141_p11, %p135_p8 }
  0x1a   :  { %145 = shalt.err (!%p142_p12)
}
  0x1b   :  { %s189_s30 = smov [#allocation6]   ;;  %s41_s7 = sshll.u32 %s253_s3, 4  ;;  %s42_s7 = int_to_ptr.vmem [resolvable:$true] %s41_s7 }
  0x1c   :  { %34 = dma.vmem_to_smem %s32_s17, 16, %s189_s30, [#allocation5]  }
  0x1d   :  { %s146_s8 = scalar_lea.vmem %s42_s7, 16  ;;  %p151_p0 = scmp.lt.s32.totalorder %s42_s7, %s42_s7 }
  0x1e   :  { %p147_p13 = scmp.ne.s32.totalorder %s42_s7, %s146_s8  ;;  %p152_p1 = scmp.lt.s32.totalorder %s146_s8, %s146_s8 }
  0x20   :  { %p153_p2 = por %p152_p1, %p151_p0 }
  0x22   :  { %p154_p3 = pnand %p153_p2, %p147_p13 }
  0x24   :  { %157 = shalt.err (!%p154_p3)
}
  0x25   :  { %s190_s0 = smov [#allocation7]  }
  0x26   :  { %44 = dma.vmem_to_smem %s42_s7, 16, %s190_s0, [#allocation8]  }
  0x27   :  { %180 = dma.done.wait [#allocation3], 32  }
  0x28   :  { %181 = vsyncadd [#allocation3], 4294967264 }
  0x29   :  { %182 = dma.done.wait [#allocation5], 16  }
  0x2a   :  { %183 = vsyncadd [#allocation5], 4294967280 }
  0x2b   :  { %184 = dma.done.wait [#allocation8], 16  }
  0x2c   :  { %185 = vsyncadd [#allocation8], 4294967280 }
  0x2d   :  { %54 = sfence }
  0x2e   :  { %s57_s9 = sld [smem:[#allocation6]]  ;;  %s102_s3 = sld [smem:[#allocation6 + $0x1]]  ;;  %v56_v0 = vld [vmem:[#allocation2] sm:$0x3] }
  0x2f   :  { %s59_s10 = sld [smem:[#allocation7]]  ;;  %s103_s11 = sld [smem:[#allocation7 + $0x1]]  ;;  %vm61_vm0 = vcmp.eq.s32.totalorder %v56_v0, 1  ;;  %vm68_vm1 = vcmp.eq.s32.totalorder %v56_v0, 2  ;;  %vm75_vm2 = vcmp.eq.s32.totalorder %v56_v0, 3 }
  0x30   :  { %s104_s12 = sld [smem:[#allocation6 + $0x2]]  ;;  %s106_s14 = sld [smem:[#allocation6 + $0x3]]  ;;  %v55_v4 = vld [vmem:[%s251_s1] sm:$0x3] }
  0x31   :  { %s105_s13 = sld [smem:[#allocation7 + $0x2]]  ;;  %s107_s15 = sld [smem:[#allocation7 + $0x3]] }
  0x32   :  { %s191_s18 = smov [#allocation9]  }
  0x33   :  { %s91_s19 = sshll.u32 %s191_s18, 4  ;;  %s92_s19 = int_to_ptr.vmem [resolvable:$true] %s91_s19 }
  0x34   :  { %v58_v1 = vstv %s57_s9  ;;  %v63_v3 = vstv %s102_s3  ;;  %s158_s20 = scalar_lea.vmem %s92_s19, 32  ;;  %p163_p5 = scmp.lt.s32.totalorder %s92_s19, %s92_s19 }
  0x35   :  { %v60_v2 = vstv %s59_s10  ;;  %v64_v5 = vsel %vm61_vm0, %v63_v3, %v58_v1  ;;  %v66_v6 = vstv %s103_s11  ;;  %p159_p4 = scmp.ne.s32.totalorder %s92_s19, %s158_s20  ;;  %p164_p6 = scmp.lt.s32.totalorder %s158_s20, %s158_s20 }
  0x36   :  { %v70_v7 = vstv %s104_s12  ;;  %v67_v8 = vsel %vm61_vm0, %v66_v6, %v60_v2  ;;  %v77_v11 = vstv %s106_s14 }
  0x37   :  { %v71_v9 = vsel %vm68_vm1, %v70_v7, %v64_v5  ;;  %v73_v10 = vstv %s105_s13  ;;  %v80_v14 = vstv %s107_s15  ;;  %p165_p7 = por %p164_p6, %p163_p5 }
  0x38   :  { %v74_v12 = vsel %vm68_vm1, %v73_v10, %v67_v8  ;;  %v78_v13 = vsel %vm75_vm2, %v77_v11, %v71_v9 }
  0x39   :  { %v81_v15 = vsel %vm75_vm2, %v80_v14, %v74_v12  ;;  %v82_v16 = vmul.f32 %v78_v13, %v55_v4  ;;  %p166_p8 = pnand %p165_p7, %p159_p4 }
  0x3b   :  { %v83_v17 = vadd.f32 %v82_v16, %v81_v15 }
  0x3d   :  { %84 = vst [vmem:[#allocation9] sm:$0x3] %v83_v17 }
  0x3e   :  { %169 = shalt.err (!%p166_p8)
}
  0x3f   :  { %s170_s22 = scalar_lea.hbm %s254_s4, 32 }
  0x40   :  { %p171_p9 = scmp.ne.s32.totalorder %s254_s4, %s170_s22  ;;  %p174_p10 = scmp.lt.u32.totalorder %s170_s22, %s254_s4 }
  0x42   :  { %p176_p11 = pnand %p174_p10, %p171_p9 }
  0x44   :  { %179 = shalt.err (!%p176_p11)
}
  0x45   :  { %94 = dma.vmem_to_hbm [thread:$0]  %s92_s19, 32, %s254_s4, [#allocation4]  }
  0x46   :  { %186 = dma.done.wait [#allocation4], 32  }
  0x47   :  { %187 = vsyncadd [#allocation4], 4294967264 }
  0x48   :  { %98 = vsyncpa [#allocation3], 1 }
  0x49   :  { %99 = vsyncpa [#allocation4], 1 }
  0x4a   :  { %100 = vsyncpa [#allocation5], 1 }
  0x4b   :  { %101 = vsyncpa [#allocation8], 1 }

</bundles_post_ra>
